<compile_context>
chip_gen: v6e
topology: v6e:2x2x1
jax: 0.10.0
libtpu: 0.0.40
codegen_flags: <defaults>
</compile_context>

<pallas_src>
import jax
import jax.numpy as jnp
import numpy as np
from jax.experimental import pallas as pl
from jax.experimental.pallas import tpu as pltpu


def broadcast_kernel(x_ref, x1_ref, c_ref, m_ref, o_ref):
    # All refs are (H*C, W) = (32, 128) float32 tiles (sublane/lane dense).
    #   c = x2 - x3 (broadcast over B, H)   m = x4 / x5 (broadcast over B)
    # ((x + x1 + c) * m + 3)^2 * 0.5
    y = (x_ref[...] + x1_ref[...] + c_ref[...]) * m_ref[...] + 3.0
    o_ref[...] = y * y * 0.5


def broadcast_forward(x, x1, x2, x3, x4, x5):
    """x: (B, C, H, W) float32.  Returns (B, H, C, W) per the module's reshape."""
    B, C, H, W = x.shape
    HC = H * C

    # torch.reshape(B,H,C,W) is a pure memory reinterpretation; flattening
    # (H, C) on top of it is also contiguous -> just reshape to (B, H*C, W).
    xr = x.reshape(B, HC, W)
    x1r = x1.reshape(B, HC, W)

    # Fold grid-invariant operands once (tiny arrays, done outside the B loop).
    c = x2 - x3[None, :]                      # (C, W)
    c_tiled = jnp.tile(c, (H, 1))             # (H*C, W): row index = h*C + c
    m = (x4[None, :, :] / x5).reshape(HC, W)  # (H*C, W)

    grid = (B,)
    out = pl.pallas_call(
        broadcast_kernel,
        out_shape=jax.ShapeDtypeStruct((B, HC, W), jnp.float32),
        grid_spec=pltpu.PrefetchScalarGridSpec(
            num_scalar_prefetch=0,
            grid=grid,
            in_specs=[
                pl.BlockSpec((pl.Squeezed(), HC, W), lambda b: (b, 0, 0)),  # x
                pl.BlockSpec((pl.Squeezed(), HC, W), lambda b: (b, 0, 0)),  # x1
                pl.BlockSpec((HC, W), lambda b: (0, 0)),                    # c = x2 - x3
                pl.BlockSpec((HC, W), lambda b: (0, 0)),                    # m = x4 / x5
            ],
            out_specs=pl.BlockSpec((pl.Squeezed(), HC, W), lambda b: (b, 0, 0)),
        ),
        compiler_params=pltpu.CompilerParams(
            dimension_semantics=("parallel",)),
    )(xr, x1r, c_tiled, m)

    return out.reshape(B, H, C, W)


def reference_forward(x, x1, x2, x3, x4, x5):
    """Straightforward JAX transcription of the PyTorch forward (no folding)."""
    B, C, H, W = x.shape
    xr = x.reshape(B, H, C, W)
    y = xr + x1
    y = y + x2
    y = y - x3
    y = y * x4
    y = y / x5
    y = y + 1.0
    y = y + 2.0
    y = y * y
    y = y / 2.0
    return y


if __name__ == "__main__":
    # Small shapes: B=2, C=4, H=8, W=128 (W lane-dense; H*C=32 sublane-dense).
    B, C, H, W = 2, 4, 8, 128
    key = jax.random.PRNGKey(0)
    k0, k1, k2, k3, k4, k5 = jax.random.split(key, 6)

    x = jax.random.normal(k0, (B, C, H, W), dtype=jnp.float32)

    # Deterministic stand-ins for torch.empty(...) operands (after reshape,
    # x has shape (B, H, C, W)):
    x1 = jax.random.normal(k1, (B, H, C, W), dtype=jnp.float32)   # x.shape
    x2 = jax.random.normal(k2, (C, W), dtype=jnp.float32)         # (shape[2], shape[3])
    x3 = jax.random.normal(k3, (W,), dtype=jnp.float32)           # (shape[3],)
    x4 = jax.random.normal(k4, (C, W), dtype=jnp.float32)         # (shape[2], shape[3])
    # Divisor kept away from zero so the result is well conditioned.
    x5 = jax.random.uniform(k5, (H, C, W), dtype=jnp.float32,
                            minval=0.5, maxval=1.5)               # (shape[1], shape[2], shape[3])

    out = broadcast_forward(x, x1, x2, x3, x4, x5)
    out = jax.block_until_ready(out)

    ref = reference_forward(x, x1, x2, x3, x4, x5)
    # Slightly looser atol: the kernel folds (x*x4)/x5 -> x*(x4/x5) and
    # (+1+2) -> +3, which differ from the reference by a few ulps pre-square.
    np.testing.assert_allclose(np.asarray(out), np.asarray(ref),
                               rtol=1e-5, atol=1e-4)

    print("KERNEL_OK")
</pallas_src>

<mosaic_0001>
module attributes {stable_mosaic.version = 11 : i64} {
  func.func @broadcast_kernel(%arg0: i32, %arg1: memref<1x32x128xf32, #tpu.memory_space<vmem>>, %arg2: memref<1x32x128xf32, #tpu.memory_space<vmem>>, %arg3: memref<32x128xf32, #tpu.memory_space<vmem>>, %arg4: memref<32x128xf32, #tpu.memory_space<vmem>>, %arg5: memref<1x32x128xf32, #tpu.memory_space<vmem>>) attributes {dimension_semantics = [#tpu.dimension_semantics<parallel>], iteration_bounds = array<i64: 2>, scalar_prefetch = 0 : i64, scratch_operands = 0 : i64, tpu.core_type = #tpu.core_type<tc>, window_params = [{transform_indices = @transform_0, window_bounds = array<i64: 1, 32, 128>}, {transform_indices = @transform_1, window_bounds = array<i64: 1, 32, 128>}, {pipeline_mode = #tpu.pipeline_mode<synchronous>, transform_indices = @transform_2, window_bounds = array<i64: 32, 128>}, {pipeline_mode = #tpu.pipeline_mode<synchronous>, transform_indices = @transform_3, window_bounds = array<i64: 32, 128>}, {transform_indices = @transform_4, window_bounds = array<i64: 1, 32, 128>}]} {
    %c0 = arith.constant 0 : index
    %c0_0 = arith.constant 0 : index
    %c0_1 = arith.constant 0 : index
    %0 = vector.load %arg1[%c0, %c0_0, %c0_1] : memref<1x32x128xf32, #tpu.memory_space<vmem>>, vector<1x32x128xf32>
    %1 = vector.shape_cast %0 : vector<1x32x128xf32> to vector<32x128xf32>
    %c0_2 = arith.constant 0 : index
    %c0_3 = arith.constant 0 : index
    %c0_4 = arith.constant 0 : index
    %2 = vector.load %arg2[%c0_2, %c0_3, %c0_4] : memref<1x32x128xf32, #tpu.memory_space<vmem>>, vector<1x32x128xf32>
    %3 = vector.shape_cast %2 : vector<1x32x128xf32> to vector<32x128xf32>
    %4 = arith.addf %1, %3 : vector<32x128xf32>
    %c0_5 = arith.constant 0 : index
    %c0_6 = arith.constant 0 : index
    %5 = vector.load %arg3[%c0_5, %c0_6] : memref<32x128xf32, #tpu.memory_space<vmem>>, vector<32x128xf32>
    %6 = arith.addf %4, %5 : vector<32x128xf32>
    %c0_7 = arith.constant 0 : index
    %c0_8 = arith.constant 0 : index
    %7 = vector.load %arg4[%c0_7, %c0_8] : memref<32x128xf32, #tpu.memory_space<vmem>>, vector<32x128xf32>
    %8 = arith.mulf %6, %7 : vector<32x128xf32>
    %cst = arith.constant 3.000000e+00 : f32
    %9 = vector.broadcast %cst : f32 to vector<32x128xf32>
    %10 = arith.addf %8, %9 : vector<32x128xf32>
    %11 = arith.mulf %10, %10 : vector<32x128xf32>
    %cst_9 = arith.constant 5.000000e-01 : f32
    %12 = vector.broadcast %cst_9 : f32 to vector<32x128xf32>
    %13 = arith.mulf %11, %12 : vector<32x128xf32>
    %c0_10 = arith.constant 0 : index
    %c0_11 = arith.constant 0 : index
    %c0_12 = arith.constant 0 : index
    %14 = vector.load %arg5[%c0_10, %c0_11, %c0_12] : memref<1x32x128xf32, #tpu.memory_space<vmem>>, vector<1x32x128xf32>
    %15 = vector.shape_cast %14 : vector<1x32x128xf32> to vector<32x128xf32>
    %16 = vector.shape_cast %13 : vector<32x128xf32> to vector<1x32x128xf32>
    tpu.vector_store %arg5[%c0_10, %c0_11, %c0_12], %16 {strides = array<i32>} : memref<1x32x128xf32, #tpu.memory_space<vmem>>, vector<1x32x128xf32>,
    return
  }
  func.func @transform_0(%arg0: i32) -> (i32, i32, i32) {
    %c0_i32 = arith.constant 0 : i32
    %c0_i32_0 = arith.constant 0 : i32
    %c0_i32_1 = arith.constant 0 : i32
    return %arg0, %c0_i32, %c0_i32_0 : i32, i32, i32
  }
  func.func @transform_1(%arg0: i32) -> (i32, i32, i32) {
    %c0_i32 = arith.constant 0 : i32
    %c0_i32_0 = arith.constant 0 : i32
    %c0_i32_1 = arith.constant 0 : i32
    return %arg0, %c0_i32, %c0_i32_0 : i32, i32, i32
  }
  func.func @transform_2(%arg0: i32) -> (i32, i32) {
    %c0_i32 = arith.constant 0 : i32
    %c0_i32_0 = arith.constant 0 : i32
    %c0_i32_1 = arith.constant 0 : i32
    return %c0_i32, %c0_i32_0 : i32, i32
  }
  func.func @transform_3(%arg0: i32) -> (i32, i32) {
    %c0_i32 = arith.constant 0 : i32
    %c0_i32_0 = arith.constant 0 : i32
    %c0_i32_1 = arith.constant 0 : i32
    return %c0_i32, %c0_i32_0 : i32, i32
  }
  func.func @transform_4(%arg0: i32) -> (i32, i32, i32) {
    %c0_i32 = arith.constant 0 : i32
    %c0_i32_0 = arith.constant 0 : i32
    %c0_i32_1 = arith.constant 0 : i32
    return %arg0, %c0_i32, %c0_i32_0 : i32, i32, i32
  }
}

</mosaic_0001>

<bundles_post_ra>
// kernel: tpu_custom_call.1
= control target key start
LH: loop header
LB: loop body
LE: loop exit
PB: predicated region body
PF: predicated region fallthrough
CT: control target
= control target key end

     0   :  { %s1032_s0 = inlined_call_operand.hbm [shape: f32[2,32,128], index: 0, kind: input, shape index: {}]   ;;  %s1033_s1 = inlined_call_operand.hbm [shape: f32[2,32,128], index: 1, kind: input, shape index: {}]   ;;  %s1034_s2 = inlined_call_operand.hbm [shape: f32[32,128], index: 2, kind: input, shape index: {}]   ;;  %s1035_s3 = inlined_call_operand.hbm [shape: f32[32,128], index: 3, kind: input, shape index: {}]   ;;  %s1036_s4 = inlined_call_operand.hbm [shape: f32[2,32,128], index: 4, kind: output, shape index: {}]  }
   0x1   :  { %1044 = sst [smem:[#allocation16_spill]] %s1032_s0 }
   0x2   :  { %9 = vsyncpa [#allocation3], 0 }
   0x3   :  { %11 = vsyncpa [#allocation3 + $0x1], 0 }
   0x4   :  { %12 = vsyncpa [#allocation6], 0 }
   0x5   :  { %14 = vsyncpa [#allocation6 + $0x1], 0 }
   0x6   :  { %15 = vsyncpa [#allocation9], 0 }
   0x7   :  { %16 = vsyncpa [#allocation4], 0 }
   0x8   :  { %18 = vsyncpa [#allocation4 + $0x1], 0  ;;  %s779_s15 = smov 0   ;;  %s781_s16 = smov 0  }
   0x9   :  { %s783_s17 = smov 0   ;;  %s785_s18 = smov 0  }
   0xa LB: > { %s800_s19 = sadd.s32 4294967295, %s743_s18   ;;  %s458_s20 = sadd.s32 4294967294, %s743_s18   ;;  %s743_s18 = sphi %s785_s18, %s1065_s18   ;;  %s739_s17 = sphi %s783_s17, %s1064_s17   ;;  %s735_s16 = sphi %s781_s16, %s1063_s16   ;;  %s731_s15 = sphi %s779_s15, %s1062_s15  }
   0xb   : > { %p44_p0 = scmp.ne.s32.totalorder %s735_s16, %s731_s15  ;;  %p1041_p1 = scmp.eq.s32.totalorder %s800_s19, 0 }
   0xc   : > { %p136_p2 = scmp.eq.s32.totalorder %s800_s19, 1  ;;  %p142_p3 = scmp.eq.s32.totalorder %s458_s20, 1 }
   0xd   : > { %p809_p4 = por %p1041_p1, %p44_p0  ;;  %p459_p5 = scmp.ge.s32.totalorder %s743_s18, 1 }
   0xe   : > { %p814_p6 = por %p142_p3, %p44_p0  ;;  %p149_p7 = scmp.lt.s32.totalorder %s743_s18, 3 }
   0xf   : > { %s1045_s21 = scalar_select %p809_p4, 1, 0 }
  0x10   : > { %s1046_s22 = scalar_select %p814_p6, 1, 0 }
  0x11   : > { %p819_p8 = pnand %p459_p5, %p149_p7  ;;  %s745_s24 = smov [#allocation7]  }
  0x12   : > { %s161_s25 = sshll.u32 %s745_s24, 4  ;;  %s746_s27 = smov [#allocation8]   ;;  %s162_s25 = int_to_ptr.vmem [resolvable:$true] %s161_s25 }
  0x13   : > { %p497_p9 = pneg %p819_p8  ;;  %s174_s28 = sshll.u32 %s746_s27, 4  ;;  %s175_s28 = int_to_ptr.vmem [resolvable:$true] %s174_s28 }
  0x14   : > { %s570_s29 = scalar_lea.vmem %s162_s25, 512  ;;  %p578_p5 = scmp.lt.s32.totalorder %s162_s25, %s162_s25 }
  0x15   : > { %p828_p11 = pnand %p497_p9, %p1041_p1  ;;  %p571_p13 = scmp.ne.s32.totalorder %s162_s25, %s570_s29 }
  0x16   : > { %p579_p7 = scmp.lt.s32.totalorder %s570_s29, %s570_s29 }
  0x17   : > { %p561_p12 = pneg %p828_p11 }
  0x18   : > { %p580_p10 = por %p579_p7, %p578_p5 }
  0x19   : > { %p573_p0 = pnand %p571_p13, %p561_p12 }
  0x1b   : > { %p574_p3 = pneg %p573_p0 }
  0x1d   : > { %p581_p9 = pnand %p580_p10, %p574_p3 }
  0x1f   : > { %584 = shalt.err (!%p581_p9)
}
  0x20   : > { %s1037_s30 = smov 128   ;;  %s1039_s5 = smov 8  }
  0x21   : > { %500 = dma.hbm_to_vmem [thread:$0]  (!%p828_p11), %s1034_s2, 512, %s162_s25, [#allocation6], %s1037_s30, %s1037_s30, %s1039_s5  }
  0x22   : > { %s596_s8 = scalar_lea.vmem %s175_s28, 512  ;;  %p604_p10 = scmp.lt.s32.totalorder %s175_s28, %s175_s28 }
  0x23   : > { %p597_p13 = scmp.ne.s32.totalorder %s175_s28, %s596_s8  ;;  %p605_p3 = scmp.lt.s32.totalorder %s596_s8, %s596_s8 }
  0x25   : > { %p599_p0 = pnand %p597_p13, %p561_p12  ;;  %p606_p7 = por %p605_p3, %p604_p10 }
  0x27   : > { %p600_p5 = pneg %p599_p0 }
  0x29   : > { %p607_p9 = pnand %p606_p7, %p600_p5 }
  0x2b   : > { %610 = shalt.err (!%p607_p9)
}
  0x2c   : > { %503 = dma.hbm_to_vmem [thread:$0]  (!%p828_p11), %s1035_s3, 512, %s175_s28, [#allocation9], %s1037_s30, %s1037_s30, %s1039_s5  }
  0x2d   : > { %s857_s11 = sadd.s32 1, %s743_s18   ;;  %s31_s12 = sadd.s32 1, %s739_s17 }
  0x2e   : > { %s28_s13 = ssub.s32 %s743_s18, %s857_s11  ;;  %p38_p12 = scmp.ne.s32.totalorder %s739_s17, %s735_s16 }
  0x2f   : > { %p29_p13 = scmp.eq.s32.totalorder %s28_s13, 0  ;;  %p39_p0 = scmp.eq.s32.totalorder %s743_s18, 0 }
  0x30   : > { %p867_p5 = por %p136_p2, %p38_p12  ;;  %p517_p10 = scmp.lt.s32.totalorder %s743_s18, 2 }
  0x31   : > { %s873_s20 = scalar_select %p29_p13, %s739_s17, %s31_s12  }
  0x32   : > { %s1049_s14 = scalar_select %p867_p5, 1, 0 }
  0x33   : > { %p40_p3 = por %p39_p0, %p38_p12  ;;  %s188_s24 = sand.u32 1, %s739_s17  }
  0x34   : > { %s463_s25 = sshll.u32 %s188_s24, 5  ;;  %s480_s26 = sshll.u32 %s743_s18, 9 }
  0x35   : > { %s1050_s0 = sld [smem:[#allocation16_spill]]  ;;  %s192_s6 = scalar_lea.vmem [#allocation2], %s463_s25 }
  0x36   : > { %s199_s7 = sshll.u32 %s192_s6, 4  ;;  %p884_p2 = pnand %p517_p10, %p40_p3  ;;  %s882_s7 = int_to_ptr.vmem [resolvable:$true] %s199_s7 }
  0x37   : > { %s891_s12 = scalar_lea.hbm %s1033_s1, %s480_s26  ;;  %s213_s13 = scalar_lea.vmem [#allocation5], %s463_s25 }
  0x38   : > { %s893_s27 = sshll.u32 %s213_s13, 4  ;;  %s895_s28 = scalar_lea.sflag [#allocation3], %s188_s24  ;;  %s926_s27 = int_to_ptr.vmem [resolvable:$true] %s893_s27 }
  0x39   : > { %p613_p7 = pneg %p884_p2 }
  0x3b   : > { %s880_s29 = scalar_lea.hbm %s1050_s0, %s480_s26  ;;  %s616_s9 = scalar_lea.hbm %s1050_s0, 1024 }
  0x3c   : > { %s611_s30 = scalar_lea.hbm %s880_s29, 512  ;;  %p617_p13 = scmp.lt.s32.totalorder %s880_s29, %s1050_s0 }
  0x3d   : > { %p612_p11 = scmp.ne.s32.totalorder %s880_s29, %s611_s30  ;;  %p618_p0 = scmp.lt.s32.totalorder %s616_s9, %s611_s30 }
  0x3f   : > { %p614_p9 = pnand %p613_p7, %p612_p11  ;;  %p619_p10 = por %p618_p0, %p617_p13 }
  0x41   : > { %p615_p12 = pneg %p614_p9 }
  0x43   : > { %p620_p3 = pnand %p619_p10, %p615_p12 }
  0x45   : > { %623 = shalt.err (!%p620_p3)
}
  0x46   : > { %s624_s24 = scalar_lea.vmem %s882_s7, 512  ;;  %s749_s5 = smov [#allocation2]  }
  0x47   : > { %p625_p1 = scmp.ne.s32.totalorder %s882_s7, %s624_s24  ;;  %s629_s25 = sshll.u32 %s749_s5, 4  ;;  %s630_s25 = int_to_ptr.vmem [resolvable:$false] %s629_s25 }
  0x48   : > { %s631_s13 = scalar_lea.vmem %s630_s25, 1024  ;;  %p632_p6 = scmp.lt.s32.totalorder %s882_s7, %s630_s25 }
  0x49   : > { %p627_p11 = pnand %p625_p1, %p613_p7  ;;  %p633_p5 = scmp.lt.s32.totalorder %s631_s13, %s624_s24 }
  0x4b   : > { %p628_p9 = pneg %p627_p11  ;;  %p634_p4 = por %p633_p5, %p632_p6 }
  0x4d   : > { %p635_p13 = pnand %p634_p4, %p628_p9 }
  0x4f   : > { %638 = shalt.err (!%p635_p13)
}
  0x50   : > { %s1052_s30 = smov 8   ;;  %s1053_s6 = smov 128  }
  0x51   : > { %507 = dma.hbm_to_vmem [thread:$0]  (!%p884_p2), %s880_s29, 512, %s882_s7, %s895_s28, %s1053_s6, %s1053_s6, %s1052_s30  }
  0x52   : > { %s209_s9 = sand.u32 1, %s743_s18   ;;  %s639_s26 = scalar_lea.hbm %s891_s12, 512 }
  0x53   : > { %s210_s10 = scalar_lea.sflag [#allocation6], %s209_s9  ;;  %p640_p1 = scmp.ne.s32.totalorder %s891_s12, %s639_s26 }
  0x54   : > { %s644_s25 = scalar_lea.hbm %s1033_s1, 1024  ;;  %p645_p5 = scmp.lt.s32.totalorder %s891_s12, %s1033_s1 }
  0x55   : > { %p642_p4 = pnand %p640_p1, %p613_p7  ;;  %p646_p12 = scmp.lt.s32.totalorder %s644_s25, %s639_s26 }
  0x57   : > { %p643_p6 = pneg %p642_p4  ;;  %p647_p0 = por %p646_p12, %p645_p5 }
  0x59   : > { %p648_p10 = pnand %p647_p0, %p643_p6 }
  0x5b   : > { %651 = shalt.err (!%p648_p10)
}
  0x5c   : > { %s652_s29 = scalar_lea.vmem %s926_s27, 512  ;;  %s750_s7 = smov [#allocation5]  }
  0x5d   : > { %p653_p3 = scmp.ne.s32.totalorder %s926_s27, %s652_s29  ;;  %s657_s28 = sshll.u32 %s750_s7, 4  ;;  %s658_s28 = int_to_ptr.vmem [resolvable:$false] %s657_s28 }
  0x5e   : > { %s659_s9 = scalar_lea.vmem %s658_s28, 1024  ;;  %p660_p13 = scmp.lt.s32.totalorder %s926_s27, %s658_s28 }
  0x5f   : > { %p655_p11 = pnand %p653_p3, %p613_p7  ;;  %p661_p1 = scmp.lt.s32.totalorder %s659_s9, %s652_s29 }
  0x61   : > { %p656_p9 = pneg %p655_p11  ;;  %p662_p4 = por %p661_p1, %p660_p13 }
  0x63   : > { %p663_p5 = pnand %p662_p4, %p656_p9 }
  0x65   : > { %666 = shalt.err (!%p663_p5)
}
  0x66   : > { %510 = dma.hbm_to_vmem [thread:$0]  (!%p884_p2), %s891_s12, 512, %s926_s27, %s210_s10, %s1053_s6, %s1053_s6, %s1052_s30  }
  0x67   : > { %232 = sbr.rel (%p819_p8) target bundleno = 151 (0x97), region = 36  ;;  %s957_s0 = sand.u32 (!%p819_p8), 1, %s735_s16  }
  0x68   : > { %s960_s26 = sshll.u32 (!%p819_p8), %s957_s0, 5  ;;  %s235_s24 = scalar_lea.sflag (!%p819_p8), [#allocation3], %s957_s0 }
  0x69   : > { %s238_s8 = scalar_lea.vmem (!%p819_p8), [#allocation2], %s960_s26  ;;  %p1054_p7 = scmp.ne.s32.totalorder (!%p819_p8), %s1045_s21, 0 }
  0x6c   : > { %710 = dma.done.wait (%p1054_p7), %s235_s24, 512  }
  0x6d   : > { %712 = vsyncadd (%p1054_p7), %s235_s24, 4294966784  ;;  %s243_s23 = sand.u32 1, %s800_s19   ;;  %s247_s27 = scalar_lea.vmem [#allocation5], %s960_s26 }
  0x6e   : > { %s244_s12 = scalar_lea.sflag [#allocation6], %s243_s23 }
  0x6f   : > { %714 = dma.done.wait (%p1054_p7), %s244_s12, 512  }
  0x70   : > { %716 = vsyncadd (%p1054_p7), %s244_s12, 4294966784  ;;  %p1055_p8 = scmp.eq.s32.totalorder %s800_s19, 0 }
  0x72   : > { %718 = dma.done.wait (%p1055_p8), [#allocation6], 512   ;;  %p1056_p2 = pmov %p1055_p8 }
  0x74   : > { %720 = vsyncadd (%p1056_p2), [#allocation6], 4294966784  ;;  %p1057_p6 = pmov %p1056_p2 }
  0x75   : > { %p1058_p12 = pmov %p1056_p2 }
  0x76   : > { %722 = dma.done.wait (%p1057_p6), [#allocation9], 512  }
  0x77   : > { %724 = vsyncadd (%p1058_p12), [#allocation9], 4294966784  ;;  %v285_v0 = vld [vmem:[%s238_s8] sm:$0xff]  ;;  %v286_v4 = vld [vmem:[%s238_s8 + $0x8] sm:$0xff]  ;;  %s284_s21 = scalar_lea.vmem [#allocation10], %s960_s26  ;;  %s482_s6 = sshll.u32 %s800_s19, 9 }
  0x78   : > { %v289_v1 = vld [vmem:[%s247_s27] sm:$0xff]  ;;  %v290_v5 = vld [vmem:[%s247_s27 + $0x8] sm:$0xff]  ;;  %v287_v9 = vld [vmem:[%s238_s8 + $0x10] sm:$0xff]  ;;  %s343_s30 = sshll.u32 %s284_s21, 4  ;;  %s989_s25 = scalar_lea.hbm %s1036_s4, %s482_s6  ;;  %s984_s30 = int_to_ptr.vmem [resolvable:$true] %s343_s30 }
  0x79   : > { %v297_v2 = vld [vmem:[#allocation7] sm:$0xff]  ;;  %v293_v3 = vadd.f32 %v289_v1, %v285_v0  ;;  %v294_v7 = vadd.f32 %v290_v5, %v286_v4  ;;  %v298_v8 = vld [vmem:[#allocation7 + $0x8] sm:$0xff]  ;;  %v291_v12 = vld [vmem:[%s247_s27 + $0x10] sm:$0xff]  ;;  %s330_s19 = scalar_lea.sflag [#allocation4], %s957_s0  ;;  %s667_s13 = scalar_lea.vmem %s984_s30, 512 }
  0x7a   : > { %v305_v6 = vld [vmem:[#allocation8] sm:$0xff]  ;;  %v306_v11 = vld [vmem:[#allocation8 + $0x8] sm:$0xff]  ;;  %v299_v13 = vld [vmem:[#allocation7 + $0x10] sm:$0xff]  ;;  %v295_v15 = vadd.f32 %v291_v12, %v287_v9  ;;  %p668_p0 = scmp.ne.s32.totalorder %s984_s30, %s667_s13  ;;  %p1059_p10 = scmp.ne.s32.totalorder %s1049_s14, 0 }
  0x7b   : > { %v301_v10 = vadd.f32 %v297_v2, %v293_v3  ;;  %v302_v14 = vadd.f32 %v298_v8, %v294_v7  ;;  %v288_v16 = vld [vmem:[%s238_s8 + $0x18] sm:$0xff]  ;;  %v307_v20 = vld [vmem:[#allocation8 + $0x10] sm:$0xff]  ;;  %s751_s29 = smov [#allocation10]  }
  0x7c   : > { %v292_v17 = vld [vmem:[%s247_s27 + $0x18] sm:$0xff]  ;;  %v303_v23 = vadd.f32 %v299_v13, %v295_v15  ;;  %p669_p3 = pnand %p668_p0, %p1059_p10  ;;  %s671_s7 = sshll.u32 %s751_s29, 4  ;;  %s672_s7 = int_to_ptr.vmem [resolvable:$false] %s671_s7 }
  0x7d   : > { %v300_v18 = vld [vmem:[#allocation7 + $0x18] sm:$0xff]  ;;  %v309_v19 = vmul.f32 %v305_v6, %v301_v10  ;;  %v296_v21 = vadd.f32 %v292_v17, %v288_v16  ;;  %v310_v22 = vmul.f32 %v306_v11, %v302_v14  ;;  %s673_s28 = scalar_lea.vmem %s672_s7, 1024  ;;  %p674_p9 = scmp.lt.s32.totalorder %s984_s30, %s672_s7 }
  0x7e   : > { %v308_v24 = vld [vmem:[#allocation8 + $0x18] sm:$0xff]  ;;  %v311_v28 = vmul.f32 %v307_v20, %v303_v23  ;;  %p670_p11 = pneg %p669_p3  ;;  %p675_p13 = scmp.lt.s32.totalorder %s673_s28, %s667_s13 }
  0x7f   : > { %v313_v25 = vadd.f32 3.0, %v309_v19  ;;  %v304_v26 = vadd.f32 %v300_v18, %v296_v21  ;;  %v314_v27 = vadd.f32 3.0, %v310_v22 }
  0x80   : > { %v315_v32 = vadd.f32 3.0, %v311_v28  ;;  %p676_p1 = por %p675_p13, %p674_p9 }
  0x81   : > { %v317_v29 = vmul.f32 %v313_v25, %v313_v25  ;;  %v312_v30 = vmul.f32 %v308_v24, %v304_v26  ;;  %v318_v31 = vmul.f32 %v314_v27, %v314_v27 }
  0x82   : > { %v319_v36 = vmul.f32 %v315_v32, %v315_v32  ;;  %p677_p4 = pnand %p676_p1, %p670_p11 }
  0x83   : > { %v321_v33 = vmul.f32 0.5, %v317_v29  ;;  %v316_v34 = vadd.f32 3.0, %v312_v30  ;;  %v322_v35 = vmul.f32 0.5, %v318_v31 }
  0x84   : > { %v323_v38 = vmul.f32 0.5, %v319_v36 }
  0x85   : > { %325 = vst [vmem:[%s284_s21] sm:$0xff] %v321_v33  ;;  %v320_v37 = vmul.f32 %v316_v34, %v316_v34  ;;  %326 = vst [vmem:[%s284_s21 + $0x8] sm:$0xff] %v322_v35 }
  0x86   : > { %327 = vst [vmem:[%s284_s21 + $0x10] sm:$0xff] %v323_v38 }
  0x87   : > { %v324_v39 = vmul.f32 0.5, %v320_v37 }
  0x89   : > { %328 = vst [vmem:[%s284_s21 + $0x18] sm:$0xff] %v324_v39 }
  0x8a   : > { %680 = shalt.err (!%p677_p4)
}
  0x8b   : > { %s681_s9 = scalar_lea.hbm %s989_s25, 512  ;;  %s685_s8 = scalar_lea.hbm %s1036_s4, 1024 }
  0x8c   : > { %p682_p5 = scmp.ne.s32.totalorder %s989_s25, %s681_s9  ;;  %p686_p2 = scmp.lt.s32.totalorder %s989_s25, %s1036_s4 }
  0x8d   : > { %p687_p6 = scmp.lt.s32.totalorder %s685_s8, %s681_s9 }
  0x8e   : > { %p683_p7 = pnand %p682_p5, %p1059_p10 }
  0x8f   : > { %p688_p12 = por %p687_p6, %p686_p2 }
  0x90   : > { %p684_p8 = pneg %p683_p7 }
  0x92   : > { %p689_p0 = pnand %p688_p12, %p684_p8 }
  0x94   : > { %692 = shalt.err (!%p689_p0)
}
  0x95   : > { %s752_s27 = smov 128   ;;  %s753_s21 = smov 8  }
  0x96   : > { %495 = dma.vmem_to_hbm [thread:$0]  (%p1059_p10), %s984_s30, 512, %s989_s25, %s330_s19, %s752_s27, %s752_s27, %s753_s21  }
  0x97 PF: > { %s358_s6 = sand.u32 1, %s731_s15   ;;  %p1060_p3 = scmp.ne.s32.totalorder %s1046_s22, 0 }
  0x98   : > { %p1061_p11 = scmp.ge.s32.totalorder %s743_s18, 2  ;;  %s359_s10 = scalar_lea.sflag [#allocation4], %s358_s6 }
  0x9a   : > { %p512_p9 = pnand %p1061_p11, %p1060_p3 }
  0x9c   : > { %p513_p13 = pneg %p512_p9 }
  0x9e   : > { %726 = dma.done.wait (%p513_p13), %s359_s10, 512  }
  0x9f   : > { %728 = vsyncadd (%p513_p13), %s359_s10, 4294966784  ;;  %p21_p1 = scmp.ge.s32.totalorder %s857_s11, 4   ;;  %s1062_s15 = smov %s735_s16 }
  0xa0   : > { %s1063_s16 = smov %s739_s17  ;;  %s1064_s17 = smov %s873_s20 }
  0xa1   : > { %s1065_s18 = smov %s857_s11  ;;  %23 = sbr.rel (!%p21_p1) target bundleno = 10 (0xa), region = 102 }
  0xa6   :  { %364 = vsyncpa [#allocation3], 1 }
  0xa7   :  { %366 = vsyncpa [#allocation3 + $0x1], 1 }
  0xa8   :  { %367 = vsyncpa [#allocation6], 1 }
  0xa9   :  { %369 = vsyncpa [#allocation6 + $0x1], 1 }
  0xaa   :  { %370 = vsyncpa [#allocation9], 1 }
  0xab   :  { %371 = vsyncpa [#allocation4], 1 }
  0xac   :  { %373 = vsyncpa [#allocation4 + $0x1], 1 }

</bundles_post_ra>
